<compile_context>
chip_gen: v7x
topology: tpu7x:2x2x1
jax: 0.10.0
libtpu: 0.0.40
codegen_flags: <defaults>
</compile_context>

<pallas_src>
import jax
import jax.numpy as jnp
from jax import lax
from jax.experimental import pallas as pl
from jax.experimental.pallas import tpu as pltpu

# small, TPU-friendly synthetic shapes
B, C, H, W_SP = 2, 4, 16, 16
D = C * H * W_SP          # 1024 (multiple of 128 -> lane-dense)
K = 128                   # number of classes (lane-dense logits)
CLASSIFIER_SCALE = 1.0


def _round_up(n, m):
    return -(-n // m) * m


def cg_kernel(x_ref, w_ref, b_ref, wt_ref, t_ref, y_ref, o_ref):
    """One (TB, D) batch tile of fused classifier guidance.

    x_ref : (TB, D)  bf16  flattened input tile
    w_ref : (D, KP)  bf16  classifier weight (single resident copy)
    b_ref : (1, KP)  f32   bias (padded class columns carry -1e30 -> exp == 0)
    wt_ref: (1, KP)  f32   time-conditioning vector
    t_ref : (TB, 1)  f32   timestep column
    y_ref : (TB, 1)  i32   class-label column (must be in [0, K))
    o_ref : (TB, D)  f32   d selected.sum() / d x  (* classifier_scale)
    """
    # forward: logits = x @ W   (bf16 MXU inputs, f32 accumulation)
    logits = lax.dot_general(
        x_ref[...], w_ref[...],
        dimension_numbers=(((1,), (0,)), ((), ())),
        preferred_element_type=jnp.float32)
    # (TB,1) and (1,KP) broadcasts -- no per-row unrolled selects.
    logits = logits + b_ref[...] + t_ref[...] * wt_ref[...]

    # numerically-stable softmax; exact reciprocal (negligible cost here,
    # removes the approx-recip bias flagged against the 1e-3 tolerance)
    m = jnp.max(logits, axis=-1, keepdims=True)
    e = jnp.exp(logits - m)
    probs = e / jnp.sum(e, axis=-1, keepdims=True)

    # one-hot(y) via lane iota against the y column (out-of-range y must be
    # guarded upstream; it would silently yield an all-zero one-hot row)
    lane = lax.broadcasted_iota(jnp.int32, logits.shape, 1)
    onehot = (lane == y_ref[...]).astype(jnp.float32)
    g = (onehot - probs).astype(jnp.bfloat16)     # d selected.sum() / d logits

    # backward: grad_x = g @ W^T as a transposed-contraction dot_general on the
    # SAME resident W copy -- no second weight stream, no wrapper transpose.
    grad = lax.dot_general(
        g, w_ref[...],
        dimension_numbers=(((1,), (1,)), ((), ())),
        preferred_element_type=jnp.float32)
    if CLASSIFIER_SCALE != 1.0:                   # trace-time gate: no mul at 1.0
        grad = grad * CLASSIFIER_SCALE
    o_ref[...] = grad


def classifier_guidance(x, t, y, w_bf, b, wt, *, k_pad_to=K):
    """Pallas wrapper.

    x: (B,C,H,W) f32, t: (B,) f32, y: (B,) i32 in [0,K),
    w_bf: (D,K) *pre-cast* bf16 weight (cast once, outside the per-step loop),
    b, wt: (K,) f32.

    For throughput, batch many guidance calls so B reaches 128 (v5e) / 256
    (v6e, v7x): the grid over batch tiles then has >1 step, the "parallel"
    semantics shard it across v7x's two TensorCores, and the MXU rows fill.
    Set k_pad_to=256 in that compute-bound regime to fill the 256-wide
    v6e/v7x MXU (padded logits are driven to -inf via the bias, so softmax and
    the gradient are unchanged).
    """
    Bn = x.shape[0]

    # batch-tile size: 8 covers the tiny test batch; at real batch sizes this
    # becomes 128/256-row MXU tiles.
    TB = min(128, _round_up(Bn, 8))
    B_PAD = _round_up(Bn, TB)
    KP = _round_up(K, k_pad_to)

    x_flat = x.reshape(Bn, D).astype(jnp.bfloat16)
    x_flat = jnp.pad(x_flat, ((0, B_PAD - Bn), (0, 0)))
    t_col = jnp.pad(t.reshape(Bn, 1).astype(jnp.float32), ((0, B_PAD - Bn), (0, 0)))
    y_col = jnp.pad(y.reshape(Bn, 1).astype(jnp.int32), ((0, B_PAD - Bn), (0, 0)))

    if KP != K:
        w_p = jnp.pad(w_bf, ((0, 0), (0, KP - K)))
        b_p = jnp.pad(b.reshape(1, K).astype(jnp.float32),
                      ((0, 0), (0, KP - K)), constant_values=-1e30)
        wt_p = jnp.pad(wt.reshape(1, K).astype(jnp.float32), ((0, 0), (0, KP - K)))
    else:
        w_p = w_bf
        b_p = b.reshape(1, K).astype(jnp.float32)
        wt_p = wt.reshape(1, K).astype(jnp.float32)

    grid = (B_PAD // TB,)

    bytes_accessed = (
        D * KP * 2               # single W stream (bf16)
        + B_PAD * D * 2          # x (bf16)
        + B_PAD * D * 4          # grad out (f32)
        + 2 * KP * 4             # bias + time vector
        + B_PAD * (4 + 4)        # t, y columns
    )
    cost = pl.CostEstimate(
        flops=2 * 2 * B_PAD * D * KP,   # forward + backward matmul
        transcendentals=B_PAD * KP,     # exp
        bytes_accessed=bytes_accessed,
    )

    grad_flat = pl.pallas_call(
        cg_kernel,
        out_shape=jax.ShapeDtypeStruct((B_PAD, D), jnp.float32),
        grid=grid,
        in_specs=[
            pl.BlockSpec((TB, D), lambda i: (i, 0)),     # x batch tile
            pl.BlockSpec((D, KP), lambda i: (0, 0)),     # W (resident across grid)
            pl.BlockSpec((1, KP), lambda i: (0, 0)),     # bias
            pl.BlockSpec((1, KP), lambda i: (0, 0)),     # time vector
            pl.BlockSpec((TB, 1), lambda i: (i, 0)),     # t column
            pl.BlockSpec((TB, 1), lambda i: (i, 0)),     # y column
        ],
        out_specs=pl.BlockSpec((TB, D), lambda i: (i, 0)),
        compiler_params=pltpu.CompilerParams(
            dimension_semantics=("parallel",)),          # shards across v7x's 2 TCs
        cost_estimate=cost,
    )(x_flat, w_p, b_p, wt_p, t_col, y_col)

    return grad_flat[:Bn].reshape(x.shape)


def reference_guidance(x, t, y, w, b, wt):
    """Pure-JAX f32 reference using autodiff (mirrors torch.autograd.grad)."""
    def loss(xx):
        logits = (xx.reshape(B, D) @ w + b.reshape(1, K)
                  + t.reshape(B, 1) * wt.reshape(1, K))
        lp = jax.nn.log_softmax(logits, axis=-1)
        selected = lp[jnp.arange(B), y]
        return selected.sum()
    return jax.grad(loss)(x) * CLASSIFIER_SCALE


if __name__ == "__main__":
    key = jax.random.PRNGKey(0)
    kx, kt, ky, kw, kb, kwt = jax.random.split(key, 6)

    x = jax.random.normal(kx, (B, C, H, W_SP), dtype=jnp.float32)
    t = jax.random.uniform(kt, (B,), dtype=jnp.float32)
    y = jax.random.randint(ky, (B,), 0, K, dtype=jnp.int32)

    # deterministic synthetic classifier parameters
    w = jax.random.normal(kw, (D, K), dtype=jnp.float32) * 0.02
    b = jax.random.normal(kb, (K,), dtype=jnp.float32) * 0.02
    wt = jax.random.normal(kwt, (K,), dtype=jnp.float32) * 0.02

    # cast W to bf16 ONCE, outside the (would-be) diffusion-step loop — the
    # wrapper and kernel never transpose or re-cast it.
    w_bf = w.astype(jnp.bfloat16)

    out = classifier_guidance(x, t, y, w_bf, b, wt)
    out = jax.block_until_ready(out)

    ref = jax.block_until_ready(reference_guidance(x, t, y, w, b, wt))
    assert out.shape == x.shape and out.dtype == jnp.float32
    assert jnp.allclose(out, ref, atol=1e-3, rtol=1e-3), "mismatch vs autodiff ref"

    print("KERNEL_OK")
</pallas_src>

<mosaic_0001>
module attributes {stable_mosaic.version = 11 : i64} {
  func.func @cg_kernel(%arg0: i32, %arg1: memref<8x1024xbf16, #tpu.memory_space<vmem>>, %arg2: memref<1024x128xbf16, #tpu.memory_space<vmem>>, %arg3: memref<1x128xf32, #tpu.memory_space<vmem>>, %arg4: memref<1x128xf32, #tpu.memory_space<vmem>>, %arg5: memref<8x1xf32, #tpu.memory_space<vmem>>, %arg6: memref<8x1xi32, #tpu.memory_space<vmem>>, %arg7: memref<8x1024xf32, #tpu.memory_space<vmem>>) attributes {dimension_semantics = [#tpu.dimension_semantics<parallel>], iteration_bounds = array<i64: 1>, scalar_prefetch = 0 : i64, scratch_operands = 0 : i64, tpu.core_type = #tpu.core_type<tc>, window_params = [{transform_indices = @transform_0, window_bounds = array<i64: 8, 1024>}, {pipeline_mode = #tpu.pipeline_mode<synchronous>, transform_indices = @transform_1, window_bounds = array<i64: 1024, 128>}, {pipeline_mode = #tpu.pipeline_mode<synchronous>, transform_indices = @transform_2, window_bounds = array<i64: 1, 128>}, {pipeline_mode = #tpu.pipeline_mode<synchronous>, transform_indices = @transform_3, window_bounds = array<i64: 1, 128>}, {transform_indices = @transform_4, window_bounds = array<i64: 8, 1>}, {transform_indices = @transform_5, window_bounds = array<i64: 8, 1>}, {transform_indices = @transform_6, window_bounds = array<i64: 8, 1024>}]} {
    %c0 = arith.constant 0 : index
    %c0_0 = arith.constant 0 : index
    %0 = vector.load %arg1[%c0, %c0_0] : memref<8x1024xbf16, #tpu.memory_space<vmem>>, vector<8x1024xbf16>
    %c0_1 = arith.constant 0 : index
    %c0_2 = arith.constant 0 : index
    %1 = vector.load %arg2[%c0_1, %c0_2] : memref<1024x128xbf16, #tpu.memory_space<vmem>>, vector<1024x128xbf16>
    %cst = arith.constant dense<0.000000e+00> : vector<8x128xf32>
    %2 = tpu.matmul %0, %1, %cst {dimension_numbers = #tpu.dot_dimension_numbers<[1], [0], [0], [1], [0, 0, 1, 1], [], []>} : vector<8x1024xbf16>, vector<1024x128xbf16>, vector<8x128xf32> -> vector<8x128xf32>
    %c0_3 = arith.constant 0 : index
    %c0_4 = arith.constant 0 : index
    %3 = vector.load %arg3[%c0_3, %c0_4] : memref<1x128xf32, #tpu.memory_space<vmem>>, vector<1x128xf32>
    %4 = vector.broadcast %3 : vector<1x128xf32> to vector<8x128xf32>
    %5 = arith.addf %2, %4 : vector<8x128xf32>
    %c0_5 = arith.constant 0 : index
    %c0_6 = arith.constant 0 : index
    %6 = vector.load %arg5[%c0_5, %c0_6] : memref<8x1xf32, #tpu.memory_space<vmem>>, vector<8x1xf32>
    %c0_7 = arith.constant 0 : index
    %c0_8 = arith.constant 0 : index
    %7 = vector.load %arg4[%c0_7, %c0_8] : memref<1x128xf32, #tpu.memory_space<vmem>>, vector<1x128xf32>
    %8 = vector.broadcast %6 : vector<8x1xf32> to vector<8x128xf32>
    %9 = vector.broadcast %7 : vector<1x128xf32> to vector<8x128xf32>
    %10 = arith.mulf %8, %9 : vector<8x128xf32>
    %11 = arith.addf %5, %10 : vector<8x128xf32>
    %cst_9 = arith.constant dense<0xFF800000> : vector<8xf32>
    %12 = vector.multi_reduction <maximumf>, %11, %cst_9 [1] : vector<8x128xf32> to vector<8xf32>
    %13 = vector.shape_cast %12 : vector<8xf32> to vector<8x1xf32>
    %14 = vector.broadcast %13 : vector<8x1xf32> to vector<8x128xf32>
    %15 = arith.subf %11, %14 : vector<8x128xf32>
    %16 = math.exp %15 : vector<8x128xf32>
    %cst_10 = arith.constant dense<0.000000e+00> : vector<8xf32>
    %17 = vector.multi_reduction <add>, %16, %cst_10 [1] : vector<8x128xf32> to vector<8xf32>
    %18 = vector.shape_cast %17 : vector<8xf32> to vector<8x1xf32>
    %19 = vector.broadcast %18 : vector<8x1xf32> to vector<8x128xf32>
    %20 = arith.divf %16, %19 : vector<8x128xf32>
    %21 = tpu.iota {dimensions = array<i32: 1>} : vector<8x128xi32>
    %c0_11 = arith.constant 0 : index
    %c0_12 = arith.constant 0 : index
    %22 = vector.load %arg6[%c0_11, %c0_12] : memref<8x1xi32, #tpu.memory_space<vmem>>, vector<8x1xi32>
    %23 = vector.broadcast %22 : vector<8x1xi32> to vector<8x128xi32>
    %24 = arith.cmpi eq, %21, %23 : vector<8x128xi32>
    %25 = arith.extui %24 : vector<8x128xi1> to vector<8x128xi32>
    %26 = arith.sitofp %25 : vector<8x128xi32> to vector<8x128xf32>
    %27 = arith.subf %26, %20 : vector<8x128xf32>
    %28 = arith.truncf %27 : vector<8x128xf32> to vector<8x128xbf16>
    %c0_13 = arith.constant 0 : index
    %c0_14 = arith.constant 0 : index
    %29 = vector.load %arg2[%c0_13, %c0_14] : memref<1024x128xbf16, #tpu.memory_space<vmem>>, vector<1024x128xbf16>
    %cst_15 = arith.constant dense<0.000000e+00> : vector<8x1024xf32>
    %30 = tpu.matmul %28, %29, %cst_15 {dimension_numbers = #tpu.dot_dimension_numbers<[1], [1], [0], [0], [0, 0, 1, 0], [], []>} : vector<8x128xbf16>, vector<1024x128xbf16>, vector<8x1024xf32> -> vector<8x1024xf32>
    %c0_16 = arith.constant 0 : index
    %c0_17 = arith.constant 0 : index
    %31 = vector.load %arg7[%c0_16, %c0_17] : memref<8x1024xf32, #tpu.memory_space<vmem>>, vector<8x1024xf32>
    tpu.vector_store %arg7[%c0_16, %c0_17], %30 {strides = array<i32>} : memref<8x1024xf32, #tpu.memory_space<vmem>>, vector<8x1024xf32>,
    return
  }
  func.func @transform_0(%arg0: i32) -> (i32, i32) {
    %c0_i32 = arith.constant 0 : i32
    %c0_i32_0 = arith.constant 0 : i32
    return %arg0, %c0_i32 : i32, i32
  }
  func.func @transform_1(%arg0: i32) -> (i32, i32) {
    %c0_i32 = arith.constant 0 : i32
    %c0_i32_0 = arith.constant 0 : i32
    %c0_i32_1 = arith.constant 0 : i32
    return %c0_i32, %c0_i32_0 : i32, i32
  }
  func.func @transform_2(%arg0: i32) -> (i32, i32) {
    %c0_i32 = arith.constant 0 : i32
    %c0_i32_0 = arith.constant 0 : i32
    %c0_i32_1 = arith.constant 0 : i32
    return %c0_i32, %c0_i32_0 : i32, i32
  }
  func.func @transform_3(%arg0: i32) -> (i32, i32) {
    %c0_i32 = arith.constant 0 : i32
    %c0_i32_0 = arith.constant 0 : i32
    %c0_i32_1 = arith.constant 0 : i32
    return %c0_i32, %c0_i32_0 : i32, i32
  }
  func.func @transform_4(%arg0: i32) -> (i32, i32) {
    %c0_i32 = arith.constant 0 : i32
    %c0_i32_0 = arith.constant 0 : i32
    return %arg0, %c0_i32 : i32, i32
  }
  func.func @transform_5(%arg0: i32) -> (i32, i32) {
    %c0_i32 = arith.constant 0 : i32
    %c0_i32_0 = arith.constant 0 : i32
    return %arg0, %c0_i32 : i32, i32
  }
  func.func @transform_6(%arg0: i32) -> (i32, i32) {
    %c0_i32 = arith.constant 0 : i32
    %c0_i32_0 = arith.constant 0 : i32
    return %arg0, %c0_i32 : i32, i32
  }
}

</mosaic_0001>

<bundles_post_ra>
// kernel: tpu_custom_call.1
= control target key start
LH: loop header
LB: loop body
LE: loop exit
PB: predicated region body
PF: predicated region fallthrough
CT: control target
= control target key end

     0   :  { %11 = vsyncpa [#allocation3], 0  ;;  %s1730_s0 = inlined_call_operand.hbm [shape: bf16[8,1024], index: 0, kind: input, shape index: {}]   ;;  %s1731_s1 = inlined_call_operand.hbm [shape: bf16[1024,128], index: 1, kind: input, shape index: {}]   ;;  %s1732_s2 = inlined_call_operand.vmem [shape: f32[1,128], index: 2, kind: input, shape index: {}]   ;;  %s1733_s3 = inlined_call_operand.vmem [shape: f32[1,128], index: 3, kind: input, shape index: {}]   ;;  %s1734_s4 = inlined_call_operand.vmem [shape: f32[8,1], index: 4, kind: input, shape index: {}]   ;;  %s1735_s5 = inlined_call_operand.vmem [shape: s32[8,1], index: 5, kind: input, shape index: {}]   ;;  %s1736_s6 = inlined_call_operand.hbm [shape: f32[8,1024], index: 6, kind: output, shape index: {}]  }
   0x1   :  { %12 = vsyncpa [#allocation6], 0 }
   0x2   :  { %13 = vsyncpa [#allocation4], 0  ;;  %s1377_s21 = smov [#allocation2]   ;;  %s1378_s23 = smov [#allocation5]  }
   0x3   :  { %s20_s22 = sshll.u32 %s1377_s21, 4  ;;  %s29_s24 = sshll.u32 %s1378_s23, 4  ;;  %s21_s22 = int_to_ptr.vmem [resolvable:$true] %s20_s22  ;;  %s1419_s24 = int_to_ptr.vmem [resolvable:$true] %s29_s24 }
   0x4   :  { %s1305_s27 = scalar_lea.hbm %s1730_s0, 512 }
   0x5   :  { %p1306_p0 = scmp.ne.s32.totalorder %s1730_s0, %s1305_s27  ;;  %p1309_p1 = scmp.lt.u32.totalorder %s1305_s27, %s1730_s0 }
   0x7   :  { %p1311_p2 = pnand %p1309_p1, %p1306_p0 }
   0x9   :  { %1314 = shalt.err (!%p1311_p2)
}
   0xa   :  { %s1315_s8 = scalar_lea.vmem %s21_s22, 512  ;;  %p1320_p4 = scmp.lt.s32.totalorder %s21_s22, %s21_s22 }
   0xb   :  { %p1316_p3 = scmp.ne.s32.totalorder %s21_s22, %s1315_s8  ;;  %p1321_p5 = scmp.lt.s32.totalorder %s1315_s8, %s1315_s8 }
   0xd   :  { %p1322_p6 = por %p1321_p5, %p1320_p4 }
   0xf   :  { %p1323_p7 = pnand %p1322_p6, %p1316_p3 }
  0x11   :  { %1326 = shalt.err (!%p1323_p7)
}
  0x12   :  { %23 = dma.hbm_to_vmem [thread:$0]  %s1730_s0, 512, %s21_s22, [#allocation3]  }
  0x13   :  { %s1327_s13 = scalar_lea.hbm %s1731_s1, 8192 }
  0x14   :  { %p1328_p8 = scmp.ne.s32.totalorder %s1731_s1, %s1327_s13  ;;  %p1331_p9 = scmp.lt.u32.totalorder %s1327_s13, %s1731_s1 }
  0x16   :  { %p1333_p10 = pnand %p1331_p9, %p1328_p8 }
  0x18   :  { %1336 = shalt.err (!%p1333_p10)
}
  0x19   :  { %s1337_s18 = scalar_lea.vmem %s1419_s24, 8192  ;;  %p1342_p12 = scmp.lt.s32.totalorder %s1419_s24, %s1419_s24 }
  0x1a   :  { %p1338_p11 = scmp.ne.s32.totalorder %s1419_s24, %s1337_s18  ;;  %p1343_p13 = scmp.lt.s32.totalorder %s1337_s18, %s1337_s18 }
  0x1c   :  { %p1344_p0 = por %p1343_p13, %p1342_p12 }
  0x1e   :  { %p1345_p1 = pnand %p1344_p0, %p1338_p11 }
  0x20   :  { %1348 = shalt.err (!%p1345_p1)
}
  0x21   :  { %s1379_s0 = smov 64   ;;  %s1380_s19 = smov 4  }
  0x22   :  { %35 = dma.hbm_to_vmem [thread:$0]  %s1731_s1, 8192, %s1419_s24, [#allocation6], %s1379_s0, %s1379_s0, %s1380_s19  }
  0x23   :  { %1371 = dma.done.wait [#allocation3], 512  }
  0x24   :  { %1372 = vsyncadd [#allocation3], 4294966784 }
  0x25   :  { %1373 = dma.done.wait [#allocation6], 8192  }
  0x26   :  { %1374 = vsyncadd [#allocation6], 4294959104  ;;  %v1381_v0 = vmov 0   ;;  %v1450_v1 = vld [vmem:[#allocation5 + $0x40] sm:$0xff]   ;;  %v1461_v5 = vld [vmem:[#allocation5 + $0x48] sm:$0xff]  }
  0x27   :  { %1227 = vset.pattern.permute.xlu0 %v1381_v0  ;;  %1228 = vset.pattern.permute.xlu1 %v1381_v0  ;;  %v1452_v2 = vld [vmem:[#allocation5 + $0xc0] sm:$0xff]   ;;  %v1464_v6 = vld [vmem:[#allocation5 + $0xc8] sm:$0xff]   ;;  %v1473_v9 = vld [vmem:[#allocation5 + $0x50] sm:$0xff]  }
  0x28   :  { %1060 = vmatprep.subr.bf16.mxu0 %v1450_v1  ;;  %v1455_v3 = vld [vmem:[#allocation5] sm:$0xff]   ;;  %1082 = vmatprep.subr.bf16.mxu1 %v1452_v2  ;;  %v1467_v7 = vld [vmem:[#allocation5 + $0x8] sm:$0xff]   ;;  %v1476_v10 = vld [vmem:[#allocation5 + $0xd0] sm:$0xff]  }
  0x29   :  { %v1458_v4 = vld [vmem:[#allocation5 + $0x80] sm:$0xff]   ;;  %1061 = vmatpush3.bf16.msra.mxu0 %v1455_v3  ;;  %v1470_v8 = vld [vmem:[#allocation5 + $0x88] sm:$0xff]   ;;  %v1479_v11 = vld [vmem:[#allocation5 + $0x10] sm:$0xff]  }
  0x2a   :  { %1083 = vmatpush3.bf16.msra.mxu1 %v1458_v4  ;;  %1062 = vmatprep.subr.bf16.mxu0 %v1461_v5  ;;  %v1482_v12 = vld [vmem:[#allocation5 + $0x90] sm:$0xff]   ;;  %v1485_v13 = vld [vmem:[#allocation5 + $0x58] sm:$0xff]   ;;  %v1497_v17 = vld [vmem:[#allocation5 + $0x60] sm:$0xff]  }
  0x2b   :  { %1084 = vmatprep.subr.bf16.mxu1 %v1464_v6  ;;  %v1488_v14 = vld [vmem:[#allocation5 + $0xd8] sm:$0xff]   ;;  %v1500_v18 = vld [vmem:[#allocation5 + $0xe0] sm:$0xff]   ;;  %v1509_v21 = vld [vmem:[#allocation5 + $0x68] sm:$0xff]  }
  0x2c   :  { %v1491_v15 = vld [vmem:[#allocation5 + $0x18] sm:$0xff]   ;;  %v1503_v19 = vld [vmem:[#allocation5 + $0x20] sm:$0xff]   ;;  %v1512_v22 = vld [vmem:[#allocation5 + $0xe8] sm:$0xff]  }
  0x2d   :  { %1063 = vmatpush3.bf16.msra.mxu0 %v1467_v7  ;;  %v1494_v16 = vld [vmem:[#allocation5 + $0x98] sm:$0xff]   ;;  %v1506_v20 = vld [vmem:[#allocation5 + $0xa0] sm:$0xff]   ;;  %v1515_v23 = vld [vmem:[#allocation5 + $0x28] sm:$0xff]  }
  0x2e   :  { %1085 = vmatpush3.bf16.msra.mxu1 %v1470_v8  ;;  %1064 = vmatprep.subr.bf16.mxu0 %v1473_v9  ;;  %v1518_v24 = vld [vmem:[#allocation5 + $0xa8] sm:$0xff]   ;;  %v1521_v25 = vld [vmem:[#allocation5 + $0x70] sm:$0xff]   ;;  %v1533_v29 = vld [vmem:[#allocation5 + $0x78] sm:$0xff]  }
  0x2f   :  { %1086 = vmatprep.subr.bf16.mxu1 %v1476_v10  ;;  %v1524_v26 = vld [vmem:[#allocation5 + $0xf0] sm:$0xff]   ;;  %v1536_v30 = vld [vmem:[#allocation5 + $0xf8] sm:$0xff]   ;;  %v51_v33 = vld [vmem:[#allocation2] sm:$0xff] }
  0x30   :  { %v1527_v27 = vld [vmem:[#allocation5 + $0x30] sm:$0xff]   ;;  %v1539_v31 = vld [vmem:[#allocation5 + $0x38] sm:$0xff]   ;;  %v52_v34 = vld [vmem:[#allocation2 + $0x8] sm:$0xff]  ;;  %v986_v35 = vcombine.low %v51_v33, %v51_v33  ;;  %v987_v36 = vcombine.high %v51_v33, %v51_v33 }
  0x31   :  { %1065 = vmatpush3.bf16.msra.mxu0 %v1479_v11  ;;  %v1530_v28 = vld [vmem:[#allocation5 + $0xb0] sm:$0xff]   ;;  %v1542_v32 = vld [vmem:[#allocation5 + $0xb8] sm:$0xff]   ;;  %v988_v37 = vcombine.low %v52_v34, %v52_v34  ;;  %v989_v38 = vcombine.high %v52_v34, %v52_v34  ;;  %v1546_v39 = vld [vmem:[#allocation5 + $0x140] sm:$0xff]  }
  0x32   :  { %1087 = vmatpush3.bf16.msra.mxu1 %v1482_v12  ;;  %1066 = vmatprep.subr.bf16.mxu0 %v1485_v13  ;;  %v1548_v40 = vld [vmem:[#allocation5 + $0x1c0] sm:$0xff]   ;;  %v1556_v43 = vld [vmem:[#allocation5 + $0x148] sm:$0xff]   ;;  %v1568_v47 = vld [vmem:[#allocation5 + $0x150] sm:$0xff]  }
  0x33   :  { %1088 = vmatprep.subr.bf16.mxu1 %v1488_v14  ;;  %634 = vmatprep.mubr.bf16.mxu0 %v987_v36  ;;  %v1550_v41 = vld [vmem:[#allocation5 + $0x100] sm:$0xff]   ;;  %v1560_v44 = vld [vmem:[#allocation5 + $0x1c8] sm:$0xff]   ;;  %v1572_v48 = vld [vmem:[#allocation5 + $0x1d0] sm:$0xff]  }
  0x34   :  { %674 = vmatprep.mubr.bf16.mxu1 %v989_v38  ;;  %v1552_v42 = vld [vmem:[#allocation5 + $0x180] sm:$0xff]   ;;  %v1563_v45 = vld [vmem:[#allocation5 + $0x108] sm:$0xff]   ;;  %v1575_v49 = vld [vmem:[#allocation5 + $0x110] sm:$0xff]  }
  0x35   :  { %1067 = vmatpush3.bf16.msra.mxu0 %v1491_v15  ;;  %v1566_v46 = vld [vmem:[#allocation5 + $0x188] sm:$0xff]   ;;  %v1578_v50 = vld [vmem:[#allocation5 + $0x190] sm:$0xff]   ;;  %v1580_v51 = vld [vmem:[#allocation5 + $0x158] sm:$0xff]  }
  0x36   :  { %1089 = vmatpush3.bf16.msra.mxu1 %v1494_v16  ;;  %1068 = vmatprep.subr.bf16.mxu0 %v1497_v17  ;;  %v1584_v52 = vld [vmem:[#allocation5 + $0x1d8] sm:$0xff]   ;;  %v1592_v55 = vld [vmem:[#allocation5 + $0x160] sm:$0xff]   ;;  %v1604_v59 = vld [vmem:[#allocation5 + $0x168] sm:$0xff]  }
  0x37   :  { %1090 = vmatprep.subr.bf16.mxu1 %v1500_v18  ;;  %v1587_v53 = vld [vmem:[#allocation5 + $0x118] sm:$0xff]   ;;  %v1596_v56 = vld [vmem:[#allocation5 + $0x1e0] sm:$0xff]   ;;  %v1608_v60 = vld [vmem:[#allocation5 + $0x1e8] sm:$0xff]  }
  0x38   :  { %v1590_v54 = vld [vmem:[#allocation5 + $0x198] sm:$0xff]   ;;  %v1599_v57 = vld [vmem:[#allocation5 + $0x120] sm:$0xff]   ;;  %v1611_v61 = vld [vmem:[#allocation5 + $0x128] sm:$0xff]  }
  0x39   :  { %1069 = vmatpush3.bf16.msra.mxu0 %v1503_v19  ;;  %v1602_v58 = vld [vmem:[#allocation5 + $0x1a0] sm:$0xff]   ;;  %1744 = vst [vmem:[#allocation11_spill] sm:$0xff] %v1611_v61  ;;  %v1614_v62 = vld [vmem:[#allocation5 + $0x1a8] sm:$0xff]   ;;  %v1616_v63 = vld [vmem:[#allocation5 + $0x170] sm:$0xff]  }
  0x3a   :  { %1091 = vmatpush3.bf16.msra.mxu1 %v1506_v20  ;;  %1070 = vmatprep.subr.bf16.mxu0 %v1509_v21  ;;  %1745 = vst [vmem:[#allocation12_spill] sm:$0xff] %v1614_v62  ;;  %1746 = vst [vmem:[#allocation13_spill] sm:$0xff] %v1616_v63  ;;  %v1620_v0 = vld [vmem:[#allocation5 + $0x1f0] sm:$0xff]   ;;  %v1632_v36 = vld [vmem:[#allocation5 + $0x1f8] sm:$0xff]  }
  0x3b   :  { %1092 = vmatprep.subr.bf16.mxu1 %v1512_v22  ;;  %1747 = vst [vmem:[#allocation14_spill] sm:$0xff] %v1620_v0  ;;  %v1623_v33 = vld [vmem:[#allocation5 + $0x130] sm:$0xff]   ;;  %v1638_v38 = vld [vmem:[#allocation5 + $0x1b8] sm:$0xff]  }
  0x3c   :  { %1748 = vst [vmem:[#allocation15_spill] sm:$0xff] %v1623_v33  ;;  %v1626_v34 = vld [vmem:[#allocation5 + $0x1b0] sm:$0xff]  }
  0x3d   :  { %1071 = vmatpush3.bf16.msra.mxu0 %v1515_v23  ;;  %1749 = vst [vmem:[#allocation16_spill] sm:$0xff] %v1626_v34 }
  0x3e   :  { %1093 = vmatpush3.bf16.msra.mxu1 %v1518_v24  ;;  %1072 = vmatprep.subr.bf16.mxu0 %v1521_v25 }
  0x3f   :  { %1094 = vmatprep.subr.bf16.mxu1 %v1524_v26 }
  0x41   :  { %1073 = vmatpush3.bf16.msra.mxu0 %v1527_v27 }
  0x42   :  { %1095 = vmatpush3.bf16.msra.mxu1 %v1530_v28  ;;  %1074 = vmatprep.subr.bf16.mxu0 %v1533_v29 }
  0x43   :  { %1096 = vmatprep.subr.bf16.mxu1 %v1536_v30 }
  0x45   :  { %1075 = vmatpush3.bf16.msra.mxu0 %v1539_v31 }
  0x46   :  { %1097 = vmatpush3.bf16.msra.mxu1 %v1542_v32  ;;  %1104 = vmatprep.subr.bf16.mxu0 %v1546_v39 }
  0x47   :  { %1126 = vmatprep.subr.bf16.mxu1 %v1548_v40 }
  0x48   :  { %635 = vmatmul.mubr.bf16.vlgmr.msra.gmra.mrb[0].mxu0 %v986_v35  ;;  %v1628_v35 = vld [vmem:[#allocation5 + $0x178] sm:$0xff]  }
  0x49   :  { %675 = vmatmul.mubr.bf16.vlgmr.msra.gmra.mrb[0].mxu1 %v988_v37  ;;  %1105 = vmatpush3.bf16.msra.mxu0 %v1550_v41  ;;  %1750 = vst [vmem:[#allocation17_spill] sm:$0xff] %v1628_v35  ;;  %v1635_v37 = vld [vmem:[#allocation5 + $0x138] sm:$0xff]  }
  0x4a   :  { %1127 = vmatpush3.bf16.msra.mxu1 %v1552_v42  ;;  %1106 = vmatprep.subr.bf16.mxu0 %v1556_v43 }
  0x4b   :  { %1128 = vmatprep.subr.bf16.mxu1 %v1560_v44 }
  0x4d   :  { %1107 = vmatpush3.bf16.msra.mxu0 %v1563_v45 }
  0x4e   :  { %1129 = vmatpush3.bf16.msra.mxu1 %v1566_v46  ;;  %1108 = vmatprep.subr.bf16.mxu0 %v1568_v47 }
  0x4f   :  { %1130 = vmatprep.subr.bf16.mxu1 %v1572_v48 }
  0x51   :  { %1109 = vmatpush3.bf16.msra.mxu0 %v1575_v49 }
  0x52   :  { %1131 = vmatpush3.bf16.msra.mxu1 %v1578_v50  ;;  %1110 = vmatprep.subr.bf16.mxu0 %v1580_v51 }
  0x53   :  { %1132 = vmatprep.subr.bf16.mxu1 %v1584_v52 }
  0x55   :  { %1111 = vmatpush3.bf16.msra.mxu0 %v1587_v53 }
  0x56   :  { %1133 = vmatpush3.bf16.msra.mxu1 %v1590_v54  ;;  %1112 = vmatprep.subr.bf16.mxu0 %v1592_v55 }
  0x57   :  { %1134 = vmatprep.subr.bf16.mxu1 %v1596_v56 }
  0x59   :  { %1113 = vmatpush3.bf16.msra.mxu0 %v1599_v57 }
  0x5a   :  { %1135 = vmatpush3.bf16.msra.mxu1 %v1602_v58  ;;  %1114 = vmatprep.subr.bf16.mxu0 %v1604_v59 }
  0x5b   :  { %1136 = vmatprep.subr.bf16.mxu1 %v1608_v60 }
  0x5d   :  { %1115 = vmatpush3.bf16.msra.mxu0 %v1611_v61  ;;  %v54_v61 = vld [vmem:[#allocation2 + $0x18] sm:$0xff] }
  0x5e   :  { %1137 = vmatpush3.bf16.msra.mxu1 %v1614_v62  ;;  %1116 = vmatprep.subr.bf16.mxu0 %v1616_v63  ;;  %v53_v63 = vld [vmem:[#allocation2 + $0x10] sm:$0xff] }
  0x5f   :  { %1138 = vmatprep.subr.bf16.mxu1 %v1620_v0  ;;  %v990_v0 = vcombine.low %v53_v63, %v53_v63  ;;  %v991_v62 = vcombine.high %v53_v63, %v53_v63 }
  0x61   :  { %1117 = vmatpush3.bf16.msra.mxu0 %v1623_v33  ;;  %v762_v33 = vld [vmem:[%s1734_s4] sm:$0xff]  ;;  %714 = vmatprep.mubr.bf16.mxu0 %v991_v62  ;;  %v786_v62 = vlaneseq }
  0x62   :  { %1139 = vmatpush3.bf16.msra.mxu1 %v1626_v34  ;;  %1118 = vmatprep.subr.bf16.mxu0 %v1628_v35  ;;  %v992_v34 = vcombine.low %v54_v61, %v54_v61  ;;  %v993_v35 = vcombine.high %v54_v61, %v54_v61 }
  0x63   :  { %1140 = vmatprep.subr.bf16.mxu1 %v1632_v36  ;;  %766 = vperm.xlu0 %1227, %v762_v33   ;;  %v787_v63 = vand.u32 127, %v786_v62 }
  0x64   :  { %754 = vmatprep.mubr.bf16.mxu1 %v993_v35 }
  0x65   :  { %1119 = vmatpush3.bf16.msra.mxu0 %v1635_v37 }
  0x66   :  { %1141 = vmatpush3.bf16.msra.mxu1 %v1638_v38  ;;  %1148 = vmatprep.subr.bf16.mxu0 %v1450_v1 }
  0x67   :  { %1166 = vmatprep.subr.bf16.mxu1 %v1452_v2 }
  0x68   :  { %715 = vmatmul.mubr.bf16.vlgmr.msra.gmra.mrb[4].mxu0 %v990_v0 }
  0x69   :  { %755 = vmatmul.mubr.bf16.vlgmr.msra.gmra.mrb[4].mxu1 %v992_v34  ;;  %v1382_v34 = vmov 0.0  }
  0x6e   :  { %1149 = vmatpush3.bf16.xpose.msra.mxu0 %v1455_v3  ;;  %v985_v3 = vld [vmem:[%s1732_s2] ss:$0 sm:$0xff] }
  0x6f   :  { %1167 = vmatpush3.bf16.xpose.msra.mxu1 %v1458_v4  ;;  %1150 = vmatprep.subr.bf16.mxu0 %v1461_v5 }
  0x70   :  { %1168 = vmatprep.subr.bf16.mxu1 %v1464_v6 }
  0x76   :  { %1151 = vmatpush3.bf16.xpose.msra.mxu0 %v1467_v7 }
  0x77   :  { %1169 = vmatpush3.bf16.xpose.msra.mxu1 %v1470_v8  ;;  %1152 = vmatprep.subr.bf16.mxu0 %v1473_v9 }
  0x78   :  { %1170 = vmatprep.subr.bf16.mxu1 %v1476_v10 }
  0x7e   :  { %1153 = vmatpush3.bf16.xpose.msra.mxu0 %v1479_v11 }
  0x7f   :  { %1171 = vmatpush3.bf16.xpose.msra.mxu1 %v1482_v12  ;;  %1154 = vmatprep.subr.bf16.mxu0 %v1485_v13 }
  0x80   :  { %1172 = vmatprep.subr.bf16.mxu1 %v1488_v14 }
  0x86   :  { %1155 = vmatpush3.bf16.xpose.msra.mxu0 %v1491_v15 }
  0x87   :  { %1173 = vmatpush3.bf16.xpose.msra.mxu1 %v1494_v16  ;;  %1156 = vmatprep.subr.bf16.mxu0 %v1497_v17 }
  0x88   :  { %1174 = vmatprep.subr.bf16.mxu1 %v1500_v18 }
  0x8e   :  { %1157 = vmatpush3.bf16.xpose.msra.mxu0 %v1503_v19  ;;  %v1058_v19 = vld [vmem:[%s1733_s3] ss:$0 sm:$0xff]  ;;  %s1383_s3 = smov [#allocation7]  }
  0x8f   :  { %1175 = vmatpush3.bf16.xpose.msra.mxu1 %v1506_v20  ;;  %1158 = vmatprep.subr.bf16.mxu0 %v1509_v21 }
  0x90   :  { %1176 = vmatprep.subr.bf16.mxu1 %v1512_v22 }
  0x96   :  { %1159 = vmatpush3.bf16.xpose.msra.mxu0 %v1515_v23 }
  0x97   :  { %1177 = vmatpush3.bf16.xpose.msra.mxu1 %v1518_v24  ;;  %1160 = vmatprep.subr.bf16.mxu0 %v1521_v25 }
  0x98   :  { %1178 = vmatprep.subr.bf16.mxu1 %v1524_v26 }
  0x9e   :  { %1161 = vmatpush3.bf16.xpose.msra.mxu0 %v1527_v27 }
  0x9f   :  { %1179 = vmatpush3.bf16.xpose.msra.mxu1 %v1530_v28  ;;  %1162 = vmatprep.subr.bf16.mxu0 %v1533_v29 }
  0xa0   :  { %1180 = vmatprep.subr.bf16.mxu1 %v1536_v30 }
  0xa6   :  { %1163 = vmatpush3.bf16.xpose.msra.mxu0 %v1539_v31 }
  0xa7   :  { %1181 = vmatpush3.bf16.xpose.msra.mxu1 %v1542_v32  ;;  %1184 = vmatprep.subr.bf16.mxu0 %v1546_v39 }
  0xa8   :  { %1202 = vmatprep.subr.bf16.mxu1 %v1548_v40  ;;  %v788_v40 = vld [vmem:[%s1735_s5] sm:$0xff]  ;;  %s975_s5 = sshll.u32 %s1383_s3, 4  ;;  %s976_s5 = int_to_ptr.vmem [resolvable:$true] %s975_s5 }
  0xa9   :  { %s1349_s27 = scalar_lea.vmem %s976_s5, 1024  ;;  %p1354_p3 = scmp.lt.s32.totalorder %s976_s5, %s976_s5 }
  0xaa   :  { %p1350_p2 = scmp.ne.s32.totalorder %s976_s5, %s1349_s27  ;;  %p1355_p4 = scmp.lt.s32.totalorder %s1349_s27, %s1349_s27 }
  0xac   :  { %p1356_p5 = por %p1355_p4, %p1354_p3 }
  0xae   :  { %p1357_p6 = pnand %p1356_p5, %p1350_p2 }
  0xe2   :  { %v767_v14 = vpop.permute.xlu0 %766 }
  0xe3   :  { %v775_v27 = vmul.f32 %v1058_v19, %v767_v14 }
 0x11b   :  { %v1076_v1 = vpop.f32.mrb[0].mxu0 }
 0x11c   :  { %v1098_v2 = vpop.f32.mrb[0].mxu1  ;;  %v1077_v4 = vpop.f32.mrb[1].mxu0 }
 0x11d   :  { %v1099_v5 = vpop.f32.mrb[1].mxu1  ;;  %v1078_v6 = vadd.f32 %v1077_v4, %v1076_v1  ;;  %v1079_v8 = vpop.f32.mrb[2].mxu0 }
 0x11e   :  { %v1100_v7 = vadd.f32 %v1099_v5, %v1098_v2  ;;  %v1101_v9 = vpop.f32.mrb[2].mxu1  ;;  %v1080_v10 = vpop.f32.mrb[3].mxu0 }
 0x11f   :  { %v1102_v11 = vpop.f32.mrb[3].mxu1  ;;  %v637_v12 = vadd.f32 %v1078_v6, %v985_v3 }
 0x121   :  { %v677_v13 = vadd.f32 %v1100_v7, %v637_v12 }
 0x13b   :  { %v1120_v15 = vpop.f32.mrb[4].mxu0 }
 0x13c   :  { %v1142_v16 = vpop.f32.mrb[4].mxu1  ;;  %v1121_v17 = vpop.f32.mrb[5].mxu0 }
 0x13d   :  { %v1143_v18 = vpop.f32.mrb[5].mxu1  ;;  %v1122_v20 = vadd.f32 %v1121_v17, %v1120_v15  ;;  %v1123_v22 = vpop.f32.mrb[6].mxu0 }
 0x13e   :  { %v1144_v21 = vadd.f32 %v1143_v18, %v1142_v16  ;;  %v1145_v23 = vpop.f32.mrb[6].mxu1  ;;  %v1124_v24 = vpop.f32.mrb[7].mxu0 }
 0x13f   :  { %v1146_v25 = vpop.f32.mrb[7].mxu1  ;;  %v717_v26 = vadd.f32 %v1122_v20, %v677_v13 }
 0x141   :  { %v757_v28 = vadd.f32 %v1144_v21, %v717_v26 }
 0x143   :  { %v776_v29 = vadd.f32 %v775_v27, %v757_v28 }
 0x145   :  { %777 = vmax.xlane.f32.xlu0 %v776_v29 }
 0x1d2   :  { %v778_v30 = vpop.xlane.xlu0 %777 }
 0x1d3   :  { %v779_v31 = vsub.f32 %v776_v29, %v778_v30 }
 0x1d5   :  { %v780_v32 = vmul.f32 1.442695, %v779_v31 }
 0x1d7   :  { %1301 = vpow2.f32 %v780_v32 }
 0x1e1   :  { %v1302_v39 = vpop.eup %1301 }
 0x1e2   :  { %782 = vadd.xlane.f32.xlu1 %v1302_v39 }
 0x1f3   :  { %790 = vperm.xlu1 %1228, %v788_v40  }
 0x26f   :  { %v783_v61 = vpop.xlane.xlu1 %782 }
 0x270   :  { %1303 = vrcp.f32 %v783_v61 }
 0x273   :  { %v791_v0 = vpop.permute.xlu1 %790 }
 0x274   :  { %vm792_vm0 = vcmp.eq.s32.totalorder %v787_v63, %v791_v0 }
 0x275   :  { %v1059_v35 = vsel %vm792_vm0, 1.0, %v1382_v34 }
 0x27a   :  { %v1304_v33 = vpop.eup %1303 }
 0x27b   :  { %v785_v1 = vmul.f32 %v1304_v33, %v1302_v39 }
 0x27d   :  { %v795_v2 = vsub.f32 %v1059_v35, %v785_v1 }
 0x27f   :  { %v796_v3 = vpack.c.bf16 %v795_v2, %v795_v2 }
 0x281   :  { %1164 = vmatprep.mubr.bf16.mxu0 %v796_v3  ;;  %1182 = vmatprep.mubr.bf16.mxu1 %v796_v3 }
 0x282   :  { %1165 = vmatmul.mubr.bf16.vlgmr.msra.gmra.mrb[8].mxu0 %v796_v3  ;;  %1183 = vmatmul.mubr.bf16.vlgmr.msra.gmra.mrb[8].mxu1 %v796_v3 }
 0x283   :  { %1185 = vmatpush3.bf16.xpose.msra.mxu0 %v1550_v41  ;;  %1203 = vmatpush3.bf16.xpose.msra.mxu1 %v1552_v42  ;;  %v1751_v41 = vld [vmem:[#allocation11_spill] sm:$0xff]  ;;  %v1752_v42 = vld [vmem:[#allocation12_spill] sm:$0xff] }
 0x284   :  { %1200 = vmatprep.mubr.bf16.mxu0 %v796_v3  ;;  %1218 = vmatprep.mubr.bf16.mxu1 %v796_v3 }
 0x285   :  { %1186 = vmatprep.subr.bf16.mxu0 %v1556_v43  ;;  %1204 = vmatprep.subr.bf16.mxu1 %v1560_v44  ;;  %v1753_v43 = vld [vmem:[#allocation13_spill] sm:$0xff]  ;;  %v1754_v44 = vld [vmem:[#allocation14_spill] sm:$0xff] }
 0x28b   :  { %1187 = vmatpush3.bf16.xpose.msra.mxu0 %v1563_v45  ;;  %1205 = vmatpush3.bf16.xpose.msra.mxu1 %v1566_v46  ;;  %v1755_v45 = vld [vmem:[#allocation15_spill] sm:$0xff]  ;;  %v1756_v46 = vld [vmem:[#allocation16_spill] sm:$0xff] }
 0x28c   :  { %1188 = vmatprep.subr.bf16.mxu0 %v1568_v47  ;;  %1206 = vmatprep.subr.bf16.mxu1 %v1572_v48  ;;  %v1757_v47 = vld [vmem:[#allocation17_spill] sm:$0xff] }
 0x293   :  { %1189 = vmatpush3.bf16.xpose.msra.mxu0 %v1575_v49  ;;  %1207 = vmatpush3.bf16.xpose.msra.mxu1 %v1578_v50 }
 0x294   :  { %1190 = vmatprep.subr.bf16.mxu0 %v1580_v51  ;;  %1208 = vmatprep.subr.bf16.mxu1 %v1584_v52 }
 0x29b   :  { %1191 = vmatpush3.bf16.xpose.msra.mxu0 %v1587_v53  ;;  %1209 = vmatpush3.bf16.xpose.msra.mxu1 %v1590_v54 }
 0x29c   :  { %1192 = vmatprep.subr.bf16.mxu0 %v1592_v55  ;;  %1210 = vmatprep.subr.bf16.mxu1 %v1596_v56 }
 0x2a3   :  { %1193 = vmatpush3.bf16.xpose.msra.mxu0 %v1599_v57  ;;  %1211 = vmatpush3.bf16.xpose.msra.mxu1 %v1602_v58 }
 0x2a4   :  { %1194 = vmatprep.subr.bf16.mxu0 %v1604_v59  ;;  %1212 = vmatprep.subr.bf16.mxu1 %v1608_v60 }
 0x2ab   :  { %1195 = vmatpush3.bf16.xpose.msra.mxu0 %v1751_v41  ;;  %1213 = vmatpush3.bf16.xpose.msra.mxu1 %v1752_v42 }
 0x2ac   :  { %1196 = vmatprep.subr.bf16.mxu0 %v1753_v43  ;;  %1214 = vmatprep.subr.bf16.mxu1 %v1754_v44 }
 0x2b3   :  { %1197 = vmatpush3.bf16.xpose.msra.mxu0 %v1755_v45  ;;  %1215 = vmatpush3.bf16.xpose.msra.mxu1 %v1756_v46 }
 0x2b4   :  { %1198 = vmatprep.subr.bf16.mxu0 %v1757_v47  ;;  %1216 = vmatprep.subr.bf16.mxu1 %v1632_v36 }
 0x2bb   :  { %1199 = vmatpush3.bf16.xpose.msra.mxu0 %v1635_v37  ;;  %1217 = vmatpush3.bf16.xpose.msra.mxu1 %v1638_v38 }
 0x2c2   :  { %1201 = vmatmul.mubr.bf16.vlgmr.msra.gmra.mrb[12].mxu0 %v796_v3  ;;  %1219 = vmatmul.mubr.bf16.vlgmr.msra.gmra.mrb[12].mxu1 %v796_v3 }
 0x355   :  { %v831_v48 = vpop.f32.mrb[8].mxu0  ;;  %v872_v49 = vpop.f32.mrb[8].mxu1 }
 0x356   :  { %961 = vst [vmem:[#allocation7] sm:$0xff] %v831_v48  ;;  %963 = vst [vmem:[#allocation7 + $0x10] sm:$0xff] %v872_v49  ;;  %v833_v50 = vpop.f32.mrb[9].mxu0  ;;  %v874_v51 = vpop.f32.mrb[9].mxu1 }
 0x357   :  { %962 = vst [vmem:[#allocation7 + $0x8] sm:$0xff] %v833_v50  ;;  %964 = vst [vmem:[#allocation7 + $0x18] sm:$0xff] %v874_v51  ;;  %v835_v52 = vpop.f32.mrb[10].mxu0  ;;  %v876_v53 = vpop.f32.mrb[10].mxu1 }
 0x358   :  { %v836_v54 = vpop.f32.mrb[11].mxu0  ;;  %v877_v55 = vpop.f32.mrb[11].mxu1 }
 0x395   :  { %v913_v56 = vpop.f32.mrb[12].mxu0  ;;  %v954_v57 = vpop.f32.mrb[12].mxu1 }
 0x396   :  { %965 = vst [vmem:[#allocation7 + $0x20] sm:$0xff] %v913_v56  ;;  %967 = vst [vmem:[#allocation7 + $0x30] sm:$0xff] %v954_v57  ;;  %v915_v58 = vpop.f32.mrb[13].mxu0  ;;  %v956_v59 = vpop.f32.mrb[13].mxu1 }
 0x397   :  { %966 = vst [vmem:[#allocation7 + $0x28] sm:$0xff] %v915_v58  ;;  %968 = vst [vmem:[#allocation7 + $0x38] sm:$0xff] %v956_v59  ;;  %v917_v60 = vpop.f32.mrb[14].mxu0  ;;  %v958_v36 = vpop.f32.mrb[14].mxu1 }
 0x398   :  { %v918_v37 = vpop.f32.mrb[15].mxu0  ;;  %v959_v38 = vpop.f32.mrb[15].mxu1 }
 0x399   :  { %1360 = shalt.err (!%p1357_p6)
}
 0x39a   :  { %s1361_s30 = scalar_lea.hbm %s1736_s6, 1024 }
 0x39b   :  { %p1362_p7 = scmp.ne.s32.totalorder %s1736_s6, %s1361_s30  ;;  %p1365_p8 = scmp.lt.u32.totalorder %s1361_s30, %s1736_s6 }
 0x39d   :  { %p1367_p9 = pnand %p1365_p8, %p1362_p7 }
 0x39f   :  { %1370 = shalt.err (!%p1367_p9)
}
 0x3a0   :  { %978 = dma.vmem_to_hbm [thread:$0]  %s976_s5, 1024, %s1736_s6, [#allocation4]  }
 0x3a1   :  { %1375 = dma.done.wait [#allocation4], 1024  }
 0x3a2   :  { %1376 = vsyncadd [#allocation4], 4294966272 }
 0x3a3   :  { %982 = vsyncpa [#allocation3], 1 }
 0x3a4   :  { %983 = vsyncpa [#allocation6], 1 }
 0x3a5   :  { %984 = vsyncpa [#allocation4], 1 }

</bundles_post_ra>
